<compile_context>
chip_gen: v7x
topology: tpu7x:2x2x1
jax: 0.10.0
libtpu: 0.0.40
codegen_flags: <defaults>
</compile_context>

<pallas_src>
import functools

import jax
import jax.numpy as jnp
from jax import lax
from jax.experimental import pallas as pl
from jax.experimental.pallas import tpu as pltpu

num_classes = 10


def _head_kernel(x_ref, w_ref, b_ref, o_ref, acc_ref, *, hw_total, mask_tail):
    # x_ref:   [tb, C, thw]  backbone features, [B,C,HW] layout, native dtype
    # w_ref:   [C, NPAD]     fc weight^T, pre-scaled by 1/(H*W), zero-padded in N
    # b_ref:   [1, NPAD]     fc bias, zero-padded in N
    # o_ref:   [tb, 1, NPAD] padded logits (f32)
    # acc_ref: [tb, C]       f32 spatial-sum accumulator (scratch)
    j = pl.program_id(1)

    @pl.when(j == 0)
    def _():
        acc_ref[...] = jnp.zeros_like(acc_ref)

    x = x_ref[...]                                   # [tb, C, thw], native dtype
    thw = x.shape[-1]
    if mask_tail:
        # Last HW chunk may extend past the array; zero the out-of-range lanes
        # (small [1,1,thw] iota — no full-tile index temp).
        lane = lax.broadcasted_iota(jnp.int32, (1, 1, thw), 2)
        valid = hw_total - j * thw
        x = jnp.where(lane < valid, x, jnp.zeros((), dtype=x.dtype))

    # Spatial partial sum; upcast fused into the reduce (no f32 tile temp).
    acc_ref[...] += jnp.sum(x, axis=-1, dtype=jnp.float32)      # [tb, C]

    @pl.when(j == pl.num_programs(1) - 1)
    def _():
        # fc on the MXU: [tb, C] @ [C, NPAD] + [1, NPAD] (pool scale is in w).
        y = jnp.dot(acc_ref[...], w_ref[...],
                    preferred_element_type=jnp.float32)         # [tb, NPAD]
        y = y + b_ref[...]
        o_ref[...] = y[:, None, :].astype(o_ref.dtype)


def new_classifier_head(feat_nchw, fc_weight, fc_bias, *, tile_b=None, tile_hw=None):
    """feat_nchw: [B, C, H, W] backbone output (NCHW, any float dtype; bf16 preferred).
    fc_weight:   [num_classes, C] (nn.Linear convention).
    fc_bias:     [num_classes].
    Returns:     [B, num_classes] logits in f32."""
    B, C, H, W = feat_nchw.shape
    nc = fc_weight.shape[0]
    HW = H * W
    itemsize = jnp.dtype(feat_nchw.dtype).itemsize

    # Lane-dense padded N (>= 128, multiple of 128).
    NPAD = max(128, ((nc + 127) // 128) * 128)

    # Free, contiguous collapse of NCHW -> [B, C, HW] (no transpose, no copy).
    x = feat_nchw.reshape(B, C, HW)

    # Fold the pooling scale into the (tiny) weight; zero-pad N to NPAD.
    w_scaled = fc_weight.astype(jnp.float32).T * (1.0 / float(HW))      # [C, nc]
    w_pad = jnp.zeros((C, NPAD), jnp.float32).at[:, :nc].set(w_scaled)
    b_pad = jnp.zeros((1, NPAD), jnp.float32).at[:, :nc].set(
        fc_bias.astype(jnp.float32))

    # ---- per-generation VMEM budget --------------------------------------
    try:
        vmem_cap = int(pltpu.get_tpu_info().vmem_capacity_bytes)
    except Exception:
        vmem_cap = 64 * 1024 * 1024                      # conservative (v7x-sized)
    if vmem_cap >= 96 * 1024 * 1024:                     # v5e / v6e: 128 MiB VMEM
        x_budget = 28 * 1024 * 1024
        vmem_limit = 100 * 1024 * 1024
    else:                                                # v7x: 64 MiB VMEM
        x_budget = 12 * 1024 * 1024
        vmem_limit = 52 * 1024 * 1024

    # ---- spatial chunking (a feature row never has to fit one tile) ------
    row_bytes = C * HW * itemsize
    if tile_hw is not None:
        thw = min(HW, max(1, int(tile_hw)))
        if thw < HW:
            thw = max(128, (thw // 128) * 128)           # lane-aligned chunk
            thw = min(thw, HW)
    elif row_bytes <= x_budget:
        thw = HW
    else:
        thw = ((x_budget // (C * itemsize)) // 128) * 128
        thw = int(max(128, min(thw, HW)))
    grid_hw = pl.cdiv(HW, thw)
    mask_tail = (grid_hw > 1) and (HW % thw != 0)

    # ---- batch tiling ------------------------------------------------------
    chunk_bytes = C * thw * itemsize
    if tile_b is None:
        tb = max(1, x_budget // max(1, chunk_bytes))
    else:
        tb = max(1, int(tile_b))
    tb = min(tb, B)
    if B >= 2:
        tb = min(tb, pl.cdiv(B, 2))    # >= 2 batch steps -> both v7x TCs get work
    if tb >= 8:
        tb = (tb // 8) * 8             # sublane-aligned tiles when possible
    tb = max(1, min(tb, B))
    grid_b = pl.cdiv(B, tb)

    kernel = functools.partial(_head_kernel, hw_total=HW, mask_tail=mask_tail)

    out_padded = pl.pallas_call(
        kernel,
        out_shape=jax.ShapeDtypeStruct((B, 1, NPAD), jnp.float32),
        grid=(grid_b, grid_hw),
        in_specs=[
            pl.BlockSpec((tb, C, thw), lambda i, j: (i, 0, j)),   # streamed features
            pl.BlockSpec((C, NPAD), lambda i, j: (0, 0)),         # resident weight
            pl.BlockSpec((1, NPAD), lambda i, j: (0, 0)),         # resident bias
        ],
        out_specs=pl.BlockSpec((tb, 1, NPAD), lambda i, j: (i, 0, 0)),
        scratch_shapes=[pltpu.VMEM((tb, C), jnp.float32)],        # pooled-sum acc
        compiler_params=pltpu.CompilerParams(
            dimension_semantics=("parallel", "arbitrary"),
            vmem_limit_bytes=vmem_limit,
        ),
    )(x, w_pad, b_pad)

    # Drop the sublane/lane padding outside the kernel.
    return out_padded[:, 0, :nc]


def _reference(feat_nchw, fc_weight, fc_bias):
    B, C, H, W = feat_nchw.shape
    pooled = jnp.mean(feat_nchw.astype(jnp.float32).reshape(B, C, H * W), axis=-1)
    return pooled @ fc_weight.astype(jnp.float32).T + fc_bias.astype(jnp.float32)


if __name__ == "__main__":
    # Small shapes consistent with the forward pass:
    #   batch=2, backbone_channels[-1]=32, spatial=16x16
    B, C, H, W = 2, 32, 16, 16

    key = jax.random.PRNGKey(0)
    k_feat, k_w, k_feat2 = jax.random.split(key, 3)

    # Synthetic backbone output (the unspecified backbone is external to this kernel).
    feat = jax.random.normal(k_feat, (B, C, H, W), dtype=jnp.float32)

    # init_weight(): nn.Linear -> weight ~ N(0, 0.01), bias = 0.
    fc_weight = 0.01 * jax.random.normal(k_w, (num_classes, C), dtype=jnp.float32)
    fc_bias = jnp.zeros((num_classes,), dtype=jnp.float32)

    # 1) default path (single HW chunk, 2 batch tiles -> both v7x cores).
    out = jax.block_until_ready(new_classifier_head(feat, fc_weight, fc_bias))
    ref = _reference(feat, fc_weight, fc_bias)
    assert out.shape == (B, num_classes)
    assert jnp.allclose(out, ref, atol=2e-5, rtol=1e-4), (
        f"default path max abs err = {jnp.max(jnp.abs(out - ref))}")

    # 2) forced HW chunking (grid_hw=2, accumulator path).
    out2 = jax.block_until_ready(
        new_classifier_head(feat, fc_weight, fc_bias, tile_hw=128))
    assert jnp.allclose(out2, ref, atol=2e-5, rtol=1e-4), (
        f"chunked path max abs err = {jnp.max(jnp.abs(out2 - ref))}")

    # 3) forced HW chunking with a partial (masked) last chunk: HW=320.
    feat3 = jax.random.normal(k_feat2, (B, C, 16, 20), dtype=jnp.float32)
    out3 = jax.block_until_ready(
        new_classifier_head(feat3, fc_weight, fc_bias, tile_hw=128))
    ref3 = _reference(feat3, fc_weight, fc_bias)
    assert jnp.allclose(out3, ref3, atol=2e-5, rtol=1e-4), (
        f"masked path max abs err = {jnp.max(jnp.abs(out3 - ref3))}")

    # 4) bf16 features (recommended production dtype; f32 accumulation inside).
    feat_bf16 = feat.astype(jnp.bfloat16)
    out4 = jax.block_until_ready(new_classifier_head(feat_bf16, fc_weight, fc_bias))
    ref4 = _reference(feat_bf16, fc_weight, fc_bias)
    assert jnp.allclose(out4, ref4, atol=1e-4, rtol=1e-3), (
        f"bf16 path max abs err = {jnp.max(jnp.abs(out4 - ref4))}")

    print("KERNEL_OK")
</pallas_src>

<mosaic_0001>
module attributes {stable_mosaic.version = 11 : i64} {
  func.func @_head_kernel(%arg0: i32, %arg1: i32, %arg2: memref<1x32x256xf32, #tpu.memory_space<vmem>>, %arg3: memref<32x128xf32, #tpu.memory_space<vmem>>, %arg4: memref<1x128xf32, #tpu.memory_space<vmem>>, %arg5: memref<1x1x128xf32, #tpu.memory_space<vmem>>, %arg6: memref<1x32xf32, #tpu.memory_space<vmem>>) attributes {dimension_semantics = [#tpu.dimension_semantics<parallel>, #tpu.dimension_semantics<arbitrary>], iteration_bounds = array<i64: 2, 1>, scalar_prefetch = 0 : i64, scratch_operands = 1 : i64, tpu.core_type = #tpu.core_type<tc>, window_params = [{transform_indices = @transform_0, window_bounds = array<i64: 1, 32, 256>}, {pipeline_mode = #tpu.pipeline_mode<synchronous>, transform_indices = @transform_1, window_bounds = array<i64: 32, 128>}, {pipeline_mode = #tpu.pipeline_mode<synchronous>, transform_indices = @transform_2, window_bounds = array<i64: 1, 128>}, {transform_indices = @transform_3, window_bounds = array<i64: 1, 1, 128>}]} {
    %c0_i32 = arith.constant 0 : i32
    %0 = arith.cmpi eq, %arg1, %c0_i32 : i32
    %1 = arith.extui %0 : i1 to i32
    %c0_i32_0 = arith.constant 0 : i32
    %2 = arith.cmpi ne, %1, %c0_i32_0 : i32
    scf.if %2 {
      %cst_9 = arith.constant 0.000000e+00 : f32
      %11 = vector.broadcast %cst_9 : f32 to vector<1x32xf32>
      %c0_10 = arith.constant 0 : index
      %c0_11 = arith.constant 0 : index
      %12 = vector.load %arg6[%c0_10, %c0_11] : memref<1x32xf32, #tpu.memory_space<vmem>>, vector<1x32xf32>
      tpu.vector_store %arg6[%c0_10, %c0_11], %11 {strides = array<i32>} : memref<1x32xf32, #tpu.memory_space<vmem>>, vector<1x32xf32>,
    } else {
    }
    %c0 = arith.constant 0 : index
    %c0_1 = arith.constant 0 : index
    %c0_2 = arith.constant 0 : index
    %3 = vector.load %arg2[%c0, %c0_1, %c0_2] : memref<1x32x256xf32, #tpu.memory_space<vmem>>, vector<1x32x256xf32>
    %c0_3 = arith.constant 0 : index
    %c0_4 = arith.constant 0 : index
    %4 = vector.load %arg6[%c0_3, %c0_4] : memref<1x32xf32, #tpu.memory_space<vmem>>, vector<1x32xf32>
    %cst = arith.constant dense<0.000000e+00> : vector<1x32xf32>
    %5 = vector.multi_reduction <add>, %3, %cst [2] : vector<1x32x256xf32> to vector<1x32xf32>
    %6 = arith.addf %4, %5 : vector<1x32xf32>
    %c0_5 = arith.constant 0 : index
    %c0_6 = arith.constant 0 : index
    %7 = vector.load %arg6[%c0_5, %c0_6] : memref<1x32xf32, #tpu.memory_space<vmem>>, vector<1x32xf32>
    tpu.vector_store %arg6[%c0_5, %c0_6], %6 {strides = array<i32>} : memref<1x32xf32, #tpu.memory_space<vmem>>, vector<1x32xf32>,
    %c0_i32_7 = arith.constant 0 : i32
    %8 = arith.cmpi eq, %arg1, %c0_i32_7 : i32
    %9 = arith.extui %8 : i1 to i32
    %c0_i32_8 = arith.constant 0 : i32
    %10 = arith.cmpi ne, %9, %c0_i32_8 : i32
    scf.if %10 {
      %c0_9 = arith.constant 0 : index
      %c0_10 = arith.constant 0 : index
      %11 = vector.load %arg6[%c0_9, %c0_10] : memref<1x32xf32, #tpu.memory_space<vmem>>, vector<1x32xf32>
      %c0_11 = arith.constant 0 : index
      %c0_12 = arith.constant 0 : index
      %12 = vector.load %arg3[%c0_11, %c0_12] : memref<32x128xf32, #tpu.memory_space<vmem>>, vector<32x128xf32>
      %cst_13 = arith.constant dense<0.000000e+00> : vector<1x128xf32>
      %13 = tpu.matmul %11, %12, %cst_13 {dimension_numbers = #tpu.dot_dimension_numbers<[1], [0], [0], [1], [0, 0, 1, 1], [], []>} : vector<1x32xf32>, vector<32x128xf32>, vector<1x128xf32> -> vector<1x128xf32>
      %c0_14 = arith.constant 0 : index
      %c0_15 = arith.constant 0 : index
      %14 = vector.load %arg4[%c0_14, %c0_15] : memref<1x128xf32, #tpu.memory_space<vmem>>, vector<1x128xf32>
      %15 = arith.addf %13, %14 : vector<1x128xf32>
      %16 = vector.shape_cast %15 : vector<1x128xf32> to vector<1x1x128xf32>
      %c0_16 = arith.constant 0 : index
      %c0_17 = arith.constant 0 : index
      %c0_18 = arith.constant 0 : index
      %17 = vector.load %arg5[%c0_16, %c0_17, %c0_18] : memref<1x1x128xf32, #tpu.memory_space<vmem>>, vector<1x1x128xf32>
      tpu.vector_store %arg5[%c0_16, %c0_17, %c0_18], %16 {strides = array<i32>} : memref<1x1x128xf32, #tpu.memory_space<vmem>>, vector<1x1x128xf32>,
    } else {
    }
    return
  }
  func.func @transform_0(%arg0: i32, %arg1: i32) -> (i32, i32, i32) {
    %c0_i32 = arith.constant 0 : i32
    %c0_i32_0 = arith.constant 0 : i32
    return %arg0, %c0_i32, %arg1 : i32, i32, i32
  }
  func.func @transform_1(%arg0: i32, %arg1: i32) -> (i32, i32) {
    %c0_i32 = arith.constant 0 : i32
    %c0_i32_0 = arith.constant 0 : i32
    %c0_i32_1 = arith.constant 0 : i32
    return %c0_i32, %c0_i32_0 : i32, i32
  }
  func.func @transform_2(%arg0: i32, %arg1: i32) -> (i32, i32) {
    %c0_i32 = arith.constant 0 : i32
    %c0_i32_0 = arith.constant 0 : i32
    %c0_i32_1 = arith.constant 0 : i32
    return %c0_i32, %c0_i32_0 : i32, i32
  }
  func.func @transform_3(%arg0: i32, %arg1: i32) -> (i32, i32, i32) {
    %c0_i32 = arith.constant 0 : i32
    %c0_i32_0 = arith.constant 0 : i32
    %c0_i32_1 = arith.constant 0 : i32
    return %arg0, %c0_i32, %c0_i32_0 : i32, i32, i32
  }
}

</mosaic_0001>

<bundles_post_ra>
// kernel: tpu_custom_call.1
= control target key start
LH: loop header
LB: loop body
LE: loop exit
PB: predicated region body
PF: predicated region fallthrough
CT: control target
= control target key end

     0   :  { %8 = vsyncpa [#allocation4], 0  ;;  %s1432_s0 = inlined_call_operand.hbm [shape: f32[2,32,256], index: 0, kind: input, shape index: {}]   ;;  %s1433_s1 = inlined_call_operand.hbm [shape: f32[32,128], index: 1, kind: input, shape index: {}]   ;;  %s1434_s2 = inlined_call_operand.vmem [shape: f32[1,128], index: 2, kind: input, shape index: {}]   ;;  %s1435_s3 = inlined_call_operand.hbm [shape: f32[2,1,128], index: 3, kind: output, shape index: {}]  }
   0x1   :  { %10 = vsyncpa [#allocation4 + $0x1], 0 }
   0x2   :  { %11 = vsyncpa [#allocation7], 0 }
   0x3   :  { %12 = vsyncpa [#allocation5], 0 }
   0x4   :  { %14 = vsyncpa [#allocation5 + $0x1], 0  ;;  %s1116_s12 = smov 0   ;;  %s1118_s13 = smov 0  }
   0x5   :  { %s1120_s14 = smov 0   ;;  %s1122_s15 = smov 0  }
   0x6   :  { %s1124_s16 = smov 0   ;;  %s1126_s17 = smov 0  }
   0x7 LB: > { %s816_s18 = sadd.s32 4294967295, %s1082_s17   ;;  %s817_s19 = sadd.s32 4294967294, %s1082_s17   ;;  %s1082_s17 = sphi %s1126_s17, %s20_s17   ;;  %s1078_s16 = sphi %s1124_s16, %s1459_s16   ;;  %s1074_s15 = sphi %s1122_s15, %s1458_s15   ;;  %s1070_s14 = sphi %s1120_s14, %s1457_s14   ;;  %s1066_s13 = sphi %s1118_s13, %s1456_s13   ;;  %s1062_s12 = sphi %s1116_s12, %s1455_s12  }
   0x8   : > { %p54_p0 = scmp.ne.s32.totalorder %s1066_s13, %s1062_s12  ;;  %p1150_p1 = scmp.eq.s32.totalorder %s816_s18, 0 }
   0x9   : > { %p1154_p2 = scmp.eq.s32.totalorder %s816_s18, 1  ;;  %p126_p3 = scmp.eq.s32.totalorder %s817_s19, 1 }
   0xa   : > { %s1440_s20 = scalar_select %p1150_p1, 1, 0 }
   0xb   : > { %s1441_s21 = scalar_select %p1154_p2, 1, 0 }
   0xc   : > { %p1160_p4 = por %p1150_p1, %p54_p0  ;;  %p818_p5 = scmp.ge.s32.totalorder %s1082_s17, 1 }
   0xd   : > { %p1165_p6 = por %p126_p3, %p54_p0  ;;  %p133_p7 = scmp.lt.s32.totalorder %s1082_s17, 3 }
   0xe   : > { %s1442_s22 = scalar_select %p1160_p4, 1, 0 }
   0xf   : > { %s1443_s23 = scalar_select %p1165_p6, 1, 0 }
  0x10   : > { %p1170_p8 = pnand %p818_p5, %p133_p7  ;;  %s1084_s25 = smov [#allocation6]  }
  0x11   : > { %s145_s26 = sshll.u32 %s1084_s25, 4  ;;  %s32_s28 = sadd.s32 1, %s1078_s16  ;;  %s146_s26 = int_to_ptr.vmem [resolvable:$true] %s145_s26 }
  0x12   : > { %s1444_s24 = scalar_select %p1170_p8, 1, 0 }
  0x13   : > { %p862_p9 = pneg %p1170_p8  ;;  %s938_s4 = scalar_lea.hbm %s1433_s1, 512 }
  0x14   : > { %p939_p12 = scmp.ne.s32.totalorder %s1433_s1, %s938_s4  ;;  %p945_p5 = scmp.lt.u32.totalorder %s938_s4, %s1433_s1 }
  0x15   : > { %p1179_p11 = pnand %p862_p9, %p1150_p1 }
  0x17   : > { %p940_p13 = pneg %p1179_p11 }
  0x19   : > { %p941_p0 = pnand %p940_p13, %p939_p12 }
  0x1b   : > { %p942_p3 = pneg %p941_p0 }
  0x1d   : > { %p947_p7 = pnand %p945_p5, %p942_p3 }
  0x1f   : > { %950 = shalt.err (!%p947_p7)
}
  0x20   : > { %s951_s9 = scalar_lea.vmem %s146_s26, 512  ;;  %p959_p1 = scmp.lt.s32.totalorder %s146_s26, %s146_s26 }
  0x21   : > { %p952_p9 = scmp.ne.s32.totalorder %s146_s26, %s951_s9  ;;  %p960_p4 = scmp.lt.s32.totalorder %s951_s9, %s951_s9 }
  0x23   : > { %p954_p10 = pnand %p952_p9, %p940_p13  ;;  %p961_p8 = por %p960_p4, %p959_p1 }
  0x25   : > { %p955_p6 = pneg %p954_p10 }
  0x27   : > { %p962_p2 = pnand %p961_p8, %p955_p6 }
  0x29   : > { %965 = shalt.err (!%p962_p2)
}
  0x2a   : > { %s1085_s10 = smov 128   ;;  %s1086_s11 = smov 8  }
  0x2b   : > { %865 = dma.hbm_to_vmem [thread:$0]  (!%p1179_p11), %s1433_s1, 512, %s146_s26, [#allocation7], %s1085_s10, %s1085_s10, %s1086_s11  }
  0x2c   : > { %p34_p1 = scmp.ge.s32.totalorder %s32_s28, 2  ;;  %s41_s25 = sadd.s32 1, %s1070_s14 }
  0x2d   : > { %p48_p2 = scmp.ne.s32.totalorder %s1070_s14, %s1066_s13  ;;  %p49_p4 = scmp.eq.s32.totalorder %s1082_s17, 0 }
  0x2e   : > { %s1461_s28 = smov (%p34_p1, %s32_s28), 0  ;;  %p1447_p8 = scmp.ne.s32.totalorder %s1441_s21, 0 }
  0x2f   : > { %p1206_p6 = por %p49_p4, %p48_p2  ;;  %s36_s27 = ssub.s32 %s1078_s16, %s1461_s28 }
  0x30   : > { %p1212_p10 = por %p1447_p8, %p48_p2  ;;  %p875_p12 = scmp.lt.s32.totalorder %s1082_s17, 2 }
  0x31   : > { %p39_p11 = scmp.eq.s32.totalorder %s36_s27, 0  ;;  %s162_s26 = sand.u32 1, %s1070_s14  }
  0x32   : > { %s821_s4 = sshll.u32 %s162_s26, 6  ;;  %s831_s6 = sshll.u32 %s1078_s16, 10 }
  0x33   : > { %s1221_s5 = scalar_select %p39_p11, %s1070_s14, %s41_s25  }
  0x34   : > { %s1227_s9 = scalar_lea.hbm %s1432_s0, %s831_s6  ;;  %s166_s21 = scalar_lea.vmem [#allocation3], %s821_s4 }
  0x35   : > { %s175_s10 = sshll.u32 %s166_s21, 4  ;;  %p1233_p13 = pnand %p875_p12, %p1206_p6  ;;  %s1229_s10 = int_to_ptr.vmem [resolvable:$true] %s175_s10 }
  0x36   : > { %s1237_s18 = scalar_lea.sflag [#allocation4], %s162_s26  ;;  %s966_s19 = scalar_lea.hbm %s1227_s9, 1024 }
  0x37   : > { %p967_p0 = scmp.ne.s32.totalorder %s1227_s9, %s966_s19  ;;  %p968_p3 = pneg %p1233_p13 }
  0x38   : > { %s971_s29 = scalar_lea.hbm %s1432_s0, 2048  ;;  %p972_p9 = scmp.lt.u32.totalorder %s1227_s9, %s1432_s0 }
  0x39   : > { %p969_p5 = pnand %p968_p3, %p967_p0  ;;  %p973_p1 = scmp.lt.u32.totalorder %s971_s29, %s966_s19 }
  0x3a   : > { %p975_p4 = scmp.lt.u32.totalorder %s966_s19, %s1227_s9 }
  0x3b   : > { %p970_p7 = pneg %p969_p5  ;;  %p974_p2 = por %p973_p1, %p972_p9 }
  0x3d   : > { %p976_p6 = por %p975_p4, %p974_p2 }
  0x3f   : > { %p977_p8 = pnand %p976_p6, %p970_p7 }
  0x41   : > { %980 = shalt.err (!%p977_p8)
}
  0x42   : > { %s981_s26 = scalar_lea.vmem %s1229_s10, 1024  ;;  %s1087_s7 = smov [#allocation3]  }
  0x43   : > { %p982_p12 = scmp.ne.s32.totalorder %s1229_s10, %s981_s26  ;;  %s986_s8 = sshll.u32 %s1087_s7, 4  ;;  %s987_s8 = int_to_ptr.vmem [resolvable:$false] %s986_s8 }
  0x44   : > { %s988_s21 = scalar_lea.vmem %s987_s8, 2048  ;;  %p989_p5 = scmp.lt.s32.totalorder %s1229_s10, %s987_s8 }
  0x45   : > { %p984_p11 = pnand %p982_p12, %p968_p3  ;;  %p990_p9 = scmp.lt.s32.totalorder %s988_s21, %s981_s26 }
  0x47   : > { %p985_p0 = pneg %p984_p11  ;;  %p991_p1 = por %p990_p9, %p989_p5 }
  0x49   : > { %p992_p2 = pnand %p991_p1, %p985_p0 }
  0x4b   : > { %995 = shalt.err (!%p992_p2)
}
  0x4c   : > { %s1088_s19 = smov 256   ;;  %s1089_s25 = smov 16  }
  0x4d   : > { %869 = dma.hbm_to_vmem [thread:$0]  (!%p1233_p13), %s1227_s9, 1024, %s1229_s10, %s1237_s18, %s1088_s19, %s1088_s19, %s1089_s25  }
  0x4e   : > { %p1450_p3 = scmp.ne.s32.totalorder %s1444_s24, 0 }
  0x4f   : > { %s1268_s27 = sand.u32 (!%p1450_p3), 1, %s1066_s13   ;;  %p1451_p7 = scmp.ne.s32.totalorder (!%p1450_p3), %s1442_s22, 0 }
  0x50   : > { %187 = sbr.rel (%p1450_p3) target bundleno = 637 (0x27d), region = 32  ;;  %s825_s29 = sshll.u32 (!%p1450_p3), %s1268_s27, 6 }
  0x51   : > { %s190_s4 = scalar_lea.sflag (!%p1450_p3), [#allocation4], %s1268_s27  ;;  %s193_s6 = scalar_lea.vmem (!%p1450_p3), [#allocation3], %s825_s29 }
  0x57   : > { %1049 = dma.done.wait (%p1451_p7), %s190_s4, 1024  }
  0x58   : > { %1051 = vsyncadd (%p1451_p7), %s190_s4, 4294966272  ;;  %p1452_p4 = scmp.ne.s32.totalorder %s1440_s20, 0 }
  0x5a   : > { %1053 = dma.done.wait (%p1452_p4), [#allocation7], 512  }
  0x5b   : > { %1055 = vsyncadd (%p1452_p4), [#allocation7], 4294966784  ;;  %v226_v0 = vld [vmem:[%s193_s6] sm:$0xff]  ;;  %v227_v1 = vld [vmem:[%s193_s6 + $0x8] sm:$0xff]  ;;  %v1090_v12 = vmov 0   ;;  %v251_v13 = vlaneseq  ;;  %vm224_vm0 = vcmask 253952  }
  0x5c   : > { %v228_v2 = vld [vmem:[%s193_s6 + $0x10] sm:$0xff]  ;;  %v235_v3 = vadd.f32 %v227_v1, %v226_v0  ;;  %v229_v4 = vld [vmem:[%s193_s6 + $0x18] sm:$0xff]  ;;  %v230_v5 = vld [vmem:[%s193_s6 + $0x20] sm:$0xff]  ;;  %936 = vset.pattern.permute.xlu0 %v1090_v12  ;;  %937 = vset.pattern.permute.xlu1 %v1090_v12  ;;  %v1091_v14 = vmov 1966171168   ;;  %vm1094_vm1 = vmmov 0  }
  0x5d   : > { %v231_v6 = vld [vmem:[%s193_s6 + $0x28] sm:$0xff]  ;;  %v232_v8 = vld [vmem:[%s193_s6 + $0x30] sm:$0xff]  ;;  %v233_v9 = vld [vmem:[%s193_s6 + $0x38] sm:$0xff]  ;;  %v238_v10 = vadd.f32 %v229_v4, %v228_v2  ;;  %v384_v15 = vunpack.c.l.s4 %v1091_v14  ;;  %v1281_v16 = vshrl.u32 %v251_v13, 7  ;;  %vm598_vm2 = vcmask 130112   ;;  %s828_s24 = sshll.u32 %s1074_s15, 4 }
  0x5e   : > { %v241_v7 = vadd.f32 %v231_v6, %v230_v5  ;;  %236 = vadd.xlane.f32.xlu0 %v235_v3  ;;  %v244_v11 = vadd.f32 %v233_v9, %v232_v8  ;;  %vm605_vm3 = vcmask 195712   ;;  %vm612_vm4 = vcmask 261312   ;;  %s218_s9 = scalar_lea.vmem [#allocation8], %s1268_s27  ;;  %s1383_s26 = scalar_lea.hbm %s1435_s3, %s828_s24 }
  0x5f   : > { %v385_v17 = vunpack.c.0.s8 %v384_v15  ;;  %v1284_v18 = vsub.s32 0, %v1281_v16  ;;  %v1287_v19 = vsub.s32 1, %v1281_v16  ;;  %v1290_v20 = vsub.s32 2, %v1281_v16  ;;  %s729_s10 = sshll.u32 %s218_s9, 4  ;;  %s717_s7 = scalar_lea.sflag [#allocation5], %s1268_s27  ;;  %s1385_s10 = int_to_ptr.vmem [resolvable:$true] %s729_s10 }
  0x60   : > { %242 = vadd.xlane.f32.xlu1 %v241_v7  ;;  %v1293_v21 = vsub.s32 3, %v1281_v16  ;;  %v1296_v22 = vsub.s32 4, %v1281_v16  ;;  %v1299_v23 = vsub.s32 5, %v1281_v16  ;;  %v1302_v24 = vsub.s32 6, %v1281_v16  ;;  %s996_s8 = scalar_lea.vmem %s1385_s10, 16  ;;  %s1095_s15 = smov [#allocation8]  }
  0x61   : > { %v1305_v25 = vsub.s32 7, %v1281_v16  ;;  %v1308_v27 = vsub.s32 %v385_v17, %v1281_v16  ;;  %vm641_vm5 = vcmask 261120   ;;  %p997_p13 = scmp.ne.s32.totalorder %s1385_s10, %s996_s8  ;;  %s1000_s21 = sshll.u32 %s1095_s15, 4  ;;  %s1001_s21 = int_to_ptr.vmem [resolvable:$false] %s1000_s21 }
  0x62   : > { %239 = vadd.xlane.f32.xlu0 %v238_v10  ;;  %s1002_s19 = scalar_lea.vmem %s1001_s21, 32  ;;  %p1003_p12 = scmp.lt.s32.totalorder %s1385_s10, %s1001_s21 }
  0x63   : > { %p998_p6 = pnand %p997_p13, %p1212_p10  ;;  %p1004_p11 = scmp.lt.s32.totalorder %s1002_s19, %s996_s8 }
  0x64   : > { %245 = vadd.xlane.f32.xlu1 %v244_v11 }
  0x65   : > { %p999_p8 = pneg %p998_p6  ;;  %p1005_p0 = por %p1004_p11, %p1003_p12 }
  0x67   : > { %p1006_p5 = pnand %p1005_p0, %p999_p8 }
  0xeb   : > { %v237_v26 = vpop.xlane.xlu0 %236 }
  0xec   : > { %v254_v29 = vrot.slane %v237_v26, %v1284_v18  ;;  %v258_v30 = vrot.slane %v237_v26, %v1287_v19  ;;  %v262_v31 = vrot.slane %v237_v26, %v1290_v20  ;;  %v266_v32 = vrot.slane %v237_v26, %v1293_v21 }
  0xed   : > { %v243_v28 = vpop.xlane.xlu1 %242  ;;  %v270_v33 = vrot.slane %v237_v26, %v1296_v22  ;;  %v274_v34 = vrot.slane %v237_v26, %v1299_v23  ;;  %v278_v35 = vrot.slane %v237_v26, %v1302_v24  ;;  %v282_v36 = vrot.slane %v237_v26, %v1305_v25 }
  0xee   : > { %v379_v37 = vcombine.low %v254_v29, %v258_v30  ;;  %v380_v38 = vcombine.low %v262_v31, %v266_v32  ;;  %v318_v39 = vrot.slane %v243_v28, %v1284_v18  ;;  %v322_v40 = vrot.slane %v243_v28, %v1287_v19 }
  0xef   : > { %v240_v41 = vpop.xlane.xlu0 %239  ;;  %v381_v42 = vcombine.low %v270_v33, %v274_v34  ;;  %v382_v43 = vcombine.low %v278_v35, %v282_v36  ;;  %v326_v44 = vrot.slane %v243_v28, %v1290_v20  ;;  %v330_v45 = vrot.slane %v243_v28, %v1293_v21 }
  0xf0   : > { %v389_v46 = vrot.slane %v379_v37, %v1308_v27  ;;  %v396_v47 = vrot.slane %v380_v38, %v1308_v27  ;;  %v286_v48 = vrot.slane %v240_v41, %v1284_v18  ;;  %v290_v49 = vrot.slane %v240_v41, %v1287_v19 }
  0xf1   : > { %v403_v50 = vrot.slane %v381_v42, %v1308_v27  ;;  %v410_v51 = vrot.slane %v382_v43, %v1308_v27  ;;  %v294_v52 = vrot.slane %v240_v41, %v1290_v20  ;;  %v298_v53 = vrot.slane %v240_v41, %v1293_v21  ;;  %v246_v2 = vpop.xlane.xlu1 %245 }
  0xf2   : > { %v411_v54 = vcombine.low %v389_v46, %v396_v47  ;;  %v302_v55 = vrot.slane %v240_v41, %v1296_v22  ;;  %v306_v56 = vrot.slane %v240_v41, %v1299_v23  ;;  %v310_v57 = vrot.slane %v240_v41, %v1302_v24 }
  0xf3   : > { %v412_v58 = vcombine.low %v403_v50, %v410_v51  ;;  %v314_v59 = vrot.slane %v240_v41, %v1305_v25  ;;  %v428_v60 = vcombine.low %v286_v48, %v290_v49  ;;  %v429_v61 = vcombine.low %v294_v52, %v298_v53 }
  0xf4   : > { %v419_v62 = vrot.slane %v411_v54, %v1308_v27  ;;  %v430_v63 = vcombine.low %v302_v55, %v306_v56  ;;  %v334_v0 = vrot.slane %v243_v28, %v1296_v22  ;;  %v338_v1 = vrot.slane %v243_v28, %v1299_v23  ;;  %v636_v55 = vld [vmem:[#allocation6] sm:$0xff]  ;;  %v637_v56 = vld [vmem:[#allocation6 + $0x8] sm:$0xff] }
  0xf5   : > { %v426_v3 = vrot.slane %v412_v58, %v1308_v27  ;;  %v431_v4 = vcombine.low %v310_v57, %v314_v59  ;;  %v438_v5 = vrot.slane %v428_v60, %v1308_v27  ;;  %v445_v6 = vrot.slane %v429_v61, %v1308_v27  ;;  %v638_v57 = vld [vmem:[#allocation6 + $0x10] sm:$0xff]  ;;  %v639_v60 = vld [vmem:[#allocation6 + $0x18] sm:$0xff] }
  0xf6   : > { %v452_v7 = vrot.slane %v430_v63, %v1308_v27  ;;  %v342_v8 = vrot.slane %v243_v28, %v1302_v24  ;;  %v346_v9 = vrot.slane %v243_v28, %v1305_v25  ;;  %v477_v10 = vcombine.low %v318_v39, %v322_v40 }
  0xf7   : > { %v427_v11 = vcombine.low %v419_v62, %v426_v3  ;;  %v459_v12 = vrot.slane %v431_v4, %v1308_v27  ;;  %v460_v14 = vcombine.low %v438_v5, %v445_v6  ;;  %v478_v15 = vcombine.low %v326_v44, %v330_v45 }
  0xf8   : > { %v479_v17 = vcombine.low %v334_v0, %v338_v1  ;;  %v480_v26 = vcombine.low %v342_v8, %v346_v9  ;;  %v487_v29 = vrot.slane %v477_v10, %v1308_v27  ;;  %v350_v30 = vrot.slane %v246_v2, %v1284_v18 }
  0xf9   : > { %576 = vperm.xlu0 %936, %v427_v11   ;;  %v461_v31 = vcombine.low %v452_v7, %v459_v12  ;;  %v468_v32 = vrot.slane %v460_v14, %v1308_v27  ;;  %v494_v33 = vrot.slane %v478_v15, %v1308_v27  ;;  %v354_v28 = vrot.slane %v246_v2, %v1287_v19 }
  0xfa   : > { %v501_v34 = vrot.slane %v479_v17, %v1308_v27  ;;  %v508_v35 = vrot.slane %v480_v26, %v1308_v27  ;;  %v358_v36 = vrot.slane %v246_v2, %v1290_v20  ;;  %v362_v37 = vrot.slane %v246_v2, %v1293_v21 }
  0xfb   : > { %v475_v38 = vrot.slane %v461_v31, %v1308_v27  ;;  %v509_v39 = vcombine.low %v487_v29, %v494_v33  ;;  %v366_v18 = vrot.slane %v246_v2, %v1296_v22  ;;  %v370_v40 = vrot.slane %v246_v2, %v1299_v23 }
  0xfc   : > { %v510_v41 = vcombine.low %v501_v34, %v508_v35  ;;  %v374_v42 = vrot.slane %v246_v2, %v1302_v24  ;;  %v378_v19 = vrot.slane %v246_v2, %v1305_v25  ;;  %v526_v43 = vcombine.low %v350_v30, %v354_v28 }
  0xfd   : > { %v476_v44 = vcombine.low %v468_v32, %v475_v38  ;;  %v517_v45 = vrot.slane %v509_v39, %v1308_v27  ;;  %v527_v46 = vcombine.low %v358_v36, %v362_v37  ;;  %v528_v20 = vcombine.low %v366_v18, %v370_v40  ;;  %v640_v32 = vld [vmem:[%s1434_s2] sm:$0x1] }
  0xfe   : > { %v524_v21 = vrot.slane %v510_v41, %v1308_v27  ;;  %v529_v47 = vcombine.low %v374_v42, %v378_v19  ;;  %v536_v48 = vrot.slane %v526_v43, %v1308_v27  ;;  %v1092_v54 = vmov 0.0  }
  0xff   : > { %579 = vperm.xlu1 %937, %v476_v44   ;;  %v543_v22 = vrot.slane %v527_v46, %v1308_v27  ;;  %v550_v23 = vrot.slane %v528_v20, %v1308_v27  ;;  %225 = vst.msk [vmem:[#allocation2] sm:$0x1] %vm224_vm0, %v1092_v54  ;;  %v1093_v58 = vmov 0.0|0.0   ;;  %v849_v59 = vpack.c.bf16 %v637_v56, %v636_v55 }
 0x100   : > { %v525_v49 = vcombine.low %v517_v45, %v524_v21  ;;  %v557_v24 = vrot.slane %v529_v47, %v1308_v27  ;;  %848 = vmatprep.subr.bf16.mxu0 %v1093_v58  ;;  %v852_v61 = vpack.c.bf16 %v639_v60, %v638_v57  ;;  %845 = vmatprep.mubr.msk.f32.mxu0 %vm1094_vm1, %v1092_v54  ;;  %v588_v62 = vand.u32 127, %v251_v13 }
 0x101   : > { %v558_v25 = vcombine.low %v536_v48, %v543_v22  ;;  %850 = vmatpush3.bf16.msra.mxu0 %v849_v59 }
 0x102   : > { %v559_v50 = vcombine.low %v550_v23, %v557_v24  ;;  %851 = vmatprep.subr.bf16.mxu0 %v1093_v58  ;;  %v593_v63 = vadd.s32 4294967288, %v588_v62  ;;  %v600_v0 = vadd.s32 4294967280, %v588_v62  ;;  %v607_v3 = vadd.s32 4294967272, %v588_v62 }
 0x103   : > { %582 = vperm.xlu1 %937, %v525_v49   ;;  %v566_v51 = vrot.slane %v558_v25, %v1308_v27  ;;  %v591_v5 = vsub.s32 %v588_v62, %v1281_v16 }
 0x104   : > { %v573_v52 = vrot.slane %v559_v50, %v1308_v27  ;;  %v596_v2 = vsub.s32 %v593_v63, %v1281_v16  ;;  %v603_v4 = vsub.s32 %v600_v0, %v1281_v16  ;;  %v610_v9 = vsub.s32 %v607_v3, %v1281_v16 }
 0x105   : > { %853 = vmatpush3.bf16.msra.mxu0 %v852_v61 }
 0x106   : > { %v574_v53 = vcombine.low %v566_v51, %v573_v52  ;;  %v234_v29 = vld [vmem:[#allocation2] sm:$0x1] }
 0x108   : > { %585 = vperm.xlu1 %937, %v574_v53  }
 0x178   : > { %v577_v7 = vpop.permute.xlu0 %576 }
 0x179   : > { %v592_v11 = vrot.slane %v577_v7, %v591_v5 }
 0x17e   : > { %v580_v1 = vpop.permute.xlu1 %579 }
 0x17f   : > { %v597_v8 = vrot.slane %v580_v1, %v596_v2 }
 0x181   : > { %v599_v12 = vsel %vm598_vm2, %v597_v8, %v592_v11 }
 0x182   : > { %v583_v6 = vpop.permute.xlu1 %582 }
 0x183   : > { %v604_v10 = vrot.slane %v583_v6, %v603_v4 }
 0x185   : > { %v606_v15 = vsel %vm605_vm3, %v604_v10, %v599_v12 }
 0x187   : > { %v586_v13 = vpop.permute.xlu1 %585 }
 0x188   : > { %v611_v14 = vrot.slane %v586_v13, %v610_v9 }
 0x18a   : > { %v613_v17 = vsel %vm612_vm4, %v611_v14, %v606_v15 }
 0x18b   : > { %v620_v26 = vrot.slane %v613_v17, %v1308_v27 }
 0x18d   : > { %v627_v30 = vrot.slane %v620_v26, %v1308_v27 }
 0x18f   : > { %v629_v31 = vadd.f32 %v627_v30, %v234_v29 }
 0x191   : > { %631 = vst.msk [vmem:[#allocation2] sm:$0x1] %vm224_vm0, %v629_v31 }
 0x198   : > { %v635_v16 = vld [vmem:[#allocation2] sm:$0x1] }
 0x199   : > { %846 = vmatmul.mubr.msk.f32.vlgmr.msra.gmra.mrb[0].mxu0 %vm641_vm5, %v635_v16 }
 0x26c   : > { %v711_v33 = vpop.f32.mrb[0].mxu0 }
 0x26d   : > { %v712_v28 = vadd.f32 %v711_v33, %v640_v32  ;;  %v847_v34 = vpop.f32.mrb[1].mxu0 }
 0x26f   : > { %715 = vst [vmem:[%s218_s9] sm:$0x1] %v712_v28 }
 0x270   : > { %1009 = shalt.err (!%p1006_p5)
}
 0x271   : > { %s1010_s25 = scalar_lea.hbm %s1383_s26, 16  ;;  %s1014_s4 = scalar_lea.hbm %s1435_s3, 32 }
 0x272   : > { %p1011_p9 = scmp.ne.s32.totalorder %s1383_s26, %s1010_s25  ;;  %p1015_p3 = scmp.lt.u32.totalorder %s1383_s26, %s1435_s3 }
 0x273   : > { %p1016_p7 = scmp.lt.u32.totalorder %s1014_s4, %s1010_s25  ;;  %p1018_p13 = scmp.lt.u32.totalorder %s1010_s25, %s1383_s26 }
 0x274   : > { %p1012_p1 = pnand %p1011_p9, %p1212_p10 }
 0x275   : > { %p1017_p4 = por %p1016_p7, %p1015_p3 }
 0x276   : > { %p1013_p2 = pneg %p1012_p1 }
 0x277   : > { %p1019_p6 = por %p1018_p13, %p1017_p4 }
 0x279   : > { %p1020_p8 = pnand %p1019_p6, %p1013_p2 }
 0x27b   : > { %1023 = shalt.err (!%p1020_p8)
}
 0x27c   : > { %860 = dma.vmem_to_hbm [thread:$0]  (%p1212_p10), %s1385_s10, 16, %s1383_s26, %s717_s7  }
 0x27d PF: > { %s741_s22 = sand.u32 1, %s1062_s12   ;;  %p1453_p12 = scmp.ne.s32.totalorder %s1443_s23, 0 }
 0x27e   : > { %p1454_p11 = scmp.ge.s32.totalorder %s1082_s17, 2  ;;  %s742_s24 = scalar_lea.sflag [#allocation5], %s741_s22 }
 0x280   : > { %p871_p0 = pnand %p1454_p11, %p1453_p12 }
 0x282   : > { %1057 = dma.done.wait (!%p871_p0), %s742_s24, 16  }
 0x283   : > { %1059 = vsyncadd (!%p871_p0), %s742_s24, 4294967280  ;;  %s20_s17 = sadd.s32 1, %s1082_s17   ;;  %s1455_s12 = smov %s1066_s13 }
 0x284   : > { %p17_p5 = scmp.ge.s32.totalorder %s20_s17, 4   ;;  %s1456_s13 = smov %s1070_s14 }
 0x285   : > { %s1457_s14 = smov %s1221_s5  ;;  %s1458_s15 = smov %s1078_s16 }
 0x286   : > { %s1459_s16 = smov %s1461_s28  ;;  %19 = sbr.rel (!%p17_p5) target bundleno = 7 (0x7), region = 89 }
 0x28d   :  { %746 = vsyncpa [#allocation4], 1 }
 0x28e   :  { %748 = vsyncpa [#allocation4 + $0x1], 1 }
 0x28f   :  { %749 = vsyncpa [#allocation7], 1 }
 0x290   :  { %750 = vsyncpa [#allocation5], 1 }
 0x291   :  { %752 = vsyncpa [#allocation5 + $0x1], 1 }

</bundles_post_ra>
